<compile_context>
chip_gen: v7x
topology: tpu7x:2x2x1
jax: 0.10.0
libtpu: 0.0.40
codegen_flags: <defaults>
</compile_context>

<pallas_src>
import math

import jax
import jax.numpy as jnp
from jax.experimental import pallas as pl
from jax.experimental.pallas import tpu as pltpu

_LANE = 128
_SUBLANE = 8


def _round_up(x, m):
    return ((x + m - 1) // m) * m


def _itemsize(dtype):
    return jnp.dtype(dtype).itemsize


def _vmem_capacity_bytes():
    try:
        return int(pltpu.get_tpu_info().vmem_capacity_bytes)
    except Exception:
        return 64 << 20  # conservative default (v7x per-core VMEM)


def _plan(N, c_feat, c_out_p, adj_item, feat_item, out_item, w_bytes,
          tile_n, tile_k, cap):
    """Pick (tile_n, tile_k, n_pad_r, n_pad_k, feat_resident, vmem_limit)."""
    # Row tile: >= 2 row blocks for small/medium N (megacore on v7x); large
    # balanced tiles otherwise.  Always a multiple of 8 (sublane).
    if tile_n is None:
        if N <= 1024:
            tile_n = max(_SUBLANE, _round_up(-(-N // 2), _SUBLANE))
        else:
            target = 256 if N <= 4096 else 512
            n_blocks = -(-N // target)
            tile_n = _round_up(-(-N // n_blocks), _SUBLANE)
    else:
        tile_n = max(_SUBLANE, _round_up(tile_n, _SUBLANE))

    # K tile: as large as the VMEM cap allows (fewer grid steps, longer DMAs),
    # balanced across chunks so padding stays small for awkward N.
    if tile_k is None:
        max_k = 2048 if cap >= (96 << 20) else 1024
        n_chunks = -(-_round_up(N, _LANE) // max_k)
        tile_k = _round_up(-(-N // n_chunks), _LANE)
    else:
        tile_k = max(_LANE, _round_up(tile_k, _LANE))

    budget = int(cap * 0.80)

    def estimate(tk, tn, resident):
        n_pad_k = _round_up(N, tk)
        est = 2 * tn * tk * adj_item                    # adj double buffer
        if resident or n_pad_k == tk:
            est += 2 * n_pad_k * c_feat * feat_item     # resident feat (worst case 2 bufs)
        else:
            est += 2 * tk * c_feat * feat_item          # streamed feat stripes
        est += 2 * tn * c_out_p * out_item              # output double buffer
        est += tn * c_feat * 4                          # f32 accumulator scratch
        est += 2 * w_bytes                              # weight / bias blocks
        return est

    feat_resident = (_round_up(N, tile_k) * c_feat * feat_item
                     <= min(16 << 20, cap // 4))

    # Shrink until the footprint fits the per-generation VMEM budget.
    while estimate(tile_k, tile_n, feat_resident) > budget:
        if feat_resident and _round_up(N, tile_k) > tile_k:
            feat_resident = False
            continue
        if tile_k > 512:
            tile_k = max(512, (tile_k // 2) // _LANE * _LANE)
            continue
        if tile_n > 128:
            tile_n = max(128, (tile_n // 2) // _SUBLANE * _SUBLANE)
            continue
        break

    n_pad_r = _round_up(N, tile_n)
    n_pad_k = _round_up(N, tile_k)
    vmem_limit = int(estimate(tile_k, tile_n, feat_resident) * 1.25) + (2 << 20)
    vmem_limit = max(32 << 20, min(vmem_limit, int(cap * 0.85)))
    return tile_n, tile_k, n_pad_r, n_pad_k, feat_resident, vmem_limit


def _make_kernel(apply_weight, has_bias, multi_k, feat_resident, tile_k):
    """Build the kernel variant for this configuration."""

    def kernel(*refs):
        it = iter(refs)
        adj_ref = next(it)
        feat_ref = next(it)
        w_ref = next(it) if apply_weight else None
        b_ref = next(it) if has_bias else None
        o_ref = next(it)
        acc_ref = next(it) if multi_k else None

        def finalize(acc_f32):
            out = acc_f32
            if apply_weight:
                # Tiny per-row-tile matmul: keep it (and the acc) in f32.
                out = jnp.dot(out, w_ref[...].astype(jnp.float32),
                              preferred_element_type=jnp.float32)
            if has_bias:
                out = out + b_ref[...].astype(jnp.float32)
            o_ref[...] = out.astype(o_ref.dtype)

        if not multi_k:
            # Single reduction step: no accumulator scratch, no init / +=.
            finalize(jnp.dot(adj_ref[...], feat_ref[...],
                             preferred_element_type=jnp.float32))
            return

        k = pl.program_id(1)

        @pl.when(k == 0)
        def _init():
            acc_ref[...] = jnp.zeros_like(acc_ref)

        if feat_resident:
            start = pl.multiple_of(k * tile_k, tile_k)
            feat_blk = feat_ref[pl.ds(start, tile_k), :]
        else:
            feat_blk = feat_ref[...]

        acc_ref[...] += jnp.dot(adj_ref[...], feat_blk,
                                preferred_element_type=jnp.float32)

        @pl.when(k == pl.num_programs(1) - 1)
        def _fin():
            finalize(acc_ref[...])

    return kernel


def graph_convolution(x, adj, weight, bias=None, *, compute_dtype=jnp.bfloat16,
                      tile_n=None, tile_k=None):
    """out = adj @ x @ weight (+ bias), matching GraphConvolution.forward.

    compute_dtype is the streaming dtype of the two N-scale MXU operands
    (adjacency and features); default bf16 halves HBM traffic on the dominant
    N^2 adjacency read, accumulation is always f32.  Pass jnp.float32 for the
    most accurate path.
    """
    N, c_in = x.shape
    assert weight.shape[0] == c_in
    c_out = weight.shape[1]
    assert adj.shape == (N, N)
    out_dtype = jnp.result_type(x.dtype, adj.dtype, weight.dtype)

    # Lane-dense output: pad C_out up to a multiple of 128 (sliced off later).
    c_out_p = _round_up(c_out, _LANE)
    w_p = weight if c_out_p == c_out else jnp.pad(
        weight, ((0, 0), (0, c_out_p - c_out)))
    has_bias = bias is not None
    b_p = None
    if has_bias:
        b_full = bias if c_out_p == c_out else jnp.pad(bias, (0, c_out_p - c_out))
        b_p = b_full.reshape(1, c_out_p).astype(jnp.float32)

    # Reassociate adj @ (x @ W): stream whichever feature width is smaller.
    # (With compute_dtype=bf16 the pre-projected x@W is rounded to bf16 before
    # the N^2 matmul -- a documented precision / bandwidth trade.)
    apply_weight_in_kernel = c_in <= c_out_p
    if apply_weight_in_kernel:
        feat = x
        w_in = w_p.astype(jnp.float32)     # finalize matmul stays f32
    else:
        feat = jnp.dot(x.astype(jnp.float32), w_p.astype(jnp.float32),
                       preferred_element_type=jnp.float32)
        w_in = None
    c_feat = feat.shape[1]

    mxu_dtype = jnp.dtype(compute_dtype)
    # TODO(synk): optional int8 (v5e/v6e) / fp8-e4m3 (v7x) adjacency streaming
    # for binary or degree-normalized adjacencies would halve HBM bytes again.

    cap = _vmem_capacity_bytes()
    w_bytes = ((c_in * c_out_p * 4) if apply_weight_in_kernel else 0) + \
              ((c_out_p * 4) if has_bias else 0)
    tile_n, tile_k, n_pad_r, n_pad_k, feat_resident, vmem_limit = _plan(
        N, c_feat, c_out_p, mxu_dtype.itemsize, mxu_dtype.itemsize,
        _itemsize(out_dtype), w_bytes, tile_n, tile_k, cap)

    grid_r = n_pad_r // tile_n
    grid_k = n_pad_k // tile_k
    multi_k = grid_k > 1

    # Zero-pad to the tile grid (padded rows/cols contribute exactly zero;
    # padded output rows/cols are sliced off at the end).
    adj_c = adj
    if (n_pad_r, n_pad_k) != (N, N):
        adj_c = jnp.pad(adj, ((0, n_pad_r - N), (0, n_pad_k - N)))
    adj_c = adj_c.astype(mxu_dtype)
    feat_c = feat if n_pad_k == N else jnp.pad(feat, ((0, n_pad_k - N), (0, 0)))
    feat_c = feat_c.astype(mxu_dtype)

    inputs = [adj_c, feat_c]
    if apply_weight_in_kernel:
        inputs.append(w_in)
    if has_bias:
        inputs.append(b_p)

    kernel = _make_kernel(apply_weight_in_kernel, has_bias, multi_k,
                          feat_resident, tile_k)

    def build_specs(use_single_buffer):
        const_map = (lambda i, k: (0, 0)) if multi_k else (lambda i: (0, 0))

        def invariant(shape):
            # Grid-invariant operand: constant index_map (fetched only once);
            # single-buffered when the running build supports pl.Buffered(1).
            if use_single_buffer:
                try:
                    return pl.BlockSpec(shape, const_map,
                                        pipeline_mode=pl.Buffered(1))
                except Exception:
                    pass
            return pl.BlockSpec(shape, const_map)

        in_specs = []
        if multi_k:
            in_specs.append(pl.BlockSpec((tile_n, tile_k), lambda i, k: (i, k)))
            if feat_resident:
                in_specs.append(invariant((n_pad_k, c_feat)))
            else:
                # Fallback for very large feature matrices: streamed stripes.
                in_specs.append(pl.BlockSpec((tile_k, c_feat),
                                             lambda i, k: (k, 0)))
            out_spec = pl.BlockSpec((tile_n, c_out_p), lambda i, k: (i, 0))
            grid = (grid_r, grid_k)
            dims = ("parallel", "arbitrary")
            scratch = [pltpu.VMEM((tile_n, c_feat), jnp.float32)]
        else:
            in_specs.append(pl.BlockSpec((tile_n, n_pad_k), lambda i: (i, 0)))
            in_specs.append(invariant((n_pad_k, c_feat)))
            out_spec = pl.BlockSpec((tile_n, c_out_p), lambda i: (i, 0))
            grid = (grid_r,)
            dims = ("parallel",)
            scratch = []
        if apply_weight_in_kernel:
            in_specs.append(invariant((c_in, c_out_p)))
        if has_bias:
            in_specs.append(invariant((1, c_out_p)))
        return grid, in_specs, out_spec, scratch, dims

    def run(use_single_buffer):
        grid, in_specs, out_spec, scratch, dims = build_specs(use_single_buffer)
        return pl.pallas_call(
            kernel,
            out_shape=jax.ShapeDtypeStruct((n_pad_r, c_out_p), out_dtype),
            grid_spec=pltpu.PrefetchScalarGridSpec(
                num_scalar_prefetch=0,
                grid=grid,
                in_specs=in_specs,
                out_specs=out_spec,
                scratch_shapes=scratch,
            ),
            compiler_params=pltpu.CompilerParams(
                dimension_semantics=dims,
                vmem_limit_bytes=vmem_limit,
            ),
        )(*inputs)

    try:
        out_p = run(True)
    except Exception:
        # Retry without single-buffered invariant operands (older builds).
        out_p = run(False)

    return out_p[:N, :c_out]


def init_weight(key, in_channels, out_channels, init="x"):
    """Deterministic re-implementation of the module's _para_init."""
    if init == "xavier":
        # xavier_normal_: std = sqrt(2 / (fan_in + fan_out))
        std = math.sqrt(2.0 / (in_channels + out_channels))
        return std * jax.random.normal(key, (in_channels, out_channels),
                                       dtype=jnp.float32)
    # kaiming_uniform_(a=sqrt(5)): for a 2-D tensor PyTorch uses fan_in=size(1)
    a = math.sqrt(5.0)
    fan_in = out_channels
    gain = math.sqrt(2.0 / (1.0 + a * a))
    bound = gain * math.sqrt(3.0 / fan_in)
    return jax.random.uniform(key, (in_channels, out_channels),
                              dtype=jnp.float32, minval=-bound, maxval=bound)


def _check(name, out, ref, rel):
    err = float(jnp.max(jnp.abs(out.astype(jnp.float32) - ref)))
    scale = float(jnp.max(jnp.abs(ref))) + 1e-6
    assert err <= rel * scale, f"{name}: err={err}, scale={scale}"


if __name__ == "__main__":
    key = jax.random.PRNGKey(0)
    keys = jax.random.split(key, 10)

    # Case 1: module defaults (bias=False), default bf16 streaming, small
    #         graph -> single-K variant, in-kernel weight matmul, 2 row blocks.
    N1, CIN1, COUT1 = 128, 32, 64
    x1 = jax.random.normal(keys[0], (N1, CIN1), dtype=jnp.float32)
    adj1 = jax.random.uniform(keys[1], (N1, N1), dtype=jnp.float32)
    w1 = init_weight(keys[2], CIN1, COUT1, init="x")

    out1 = jax.block_until_ready(graph_convolution(x1, adj1, w1))
    ref1 = adj1 @ x1 @ w1
    assert out1.shape == (N1, COUT1)
    _check("case1(bf16)", out1, ref1, 5e-2)

    # Case 2: bias=True, non-divisible N (padding path), c_out_p < c_in ->
    #         pre-projected (reassociated) features, f32 streaming, forced
    #         K-tiling -> multi-K accumulator + resident feature block.
    N2, CIN2, COUT2 = 200, 256, 64
    x2 = jax.random.normal(keys[3], (N2, CIN2), dtype=jnp.float32)
    adj2 = jax.random.uniform(keys[4], (N2, N2), dtype=jnp.float32)
    w2 = init_weight(keys[5], CIN2, COUT2, init="xavier")
    b2 = 0.1 * jax.random.normal(keys[6], (COUT2,), dtype=jnp.float32)

    out2 = jax.block_until_ready(
        graph_convolution(x2, adj2, w2, b2, compute_dtype=jnp.float32,
                          tile_k=128))
    ref2 = adj2 @ (x2 @ w2) + b2
    assert out2.shape == (N2, COUT2)
    _check("case2(f32,padded,preproj)", out2, ref2, 1e-2)

    # Case 3: bias=True, in-kernel weight path, multi-K accumulator, f32.
    N3, CIN3, COUT3 = 192, 64, 160
    x3 = jax.random.normal(keys[7], (N3, CIN3), dtype=jnp.float32)
    adj3 = jax.random.uniform(keys[8], (N3, N3), dtype=jnp.float32)
    w3 = init_weight(keys[9], CIN3, COUT3, init="x")
    b3 = jnp.zeros((COUT3,), dtype=jnp.float32)

    out3 = jax.block_until_ready(
        graph_convolution(x3, adj3, w3, b3, compute_dtype=jnp.float32,
                          tile_k=128))
    ref3 = adj3 @ x3 @ w3
    assert out3.shape == (N3, COUT3)
    _check("case3(f32,multiK,inkernelW)", out3, ref3, 1e-2)

    print("KERNEL_OK")
</pallas_src>

<mosaic_0001>
module attributes {stable_mosaic.version = 11 : i64} {
  func.func @kernel(%arg0: i32, %arg1: memref<64x128xbf16, #tpu.memory_space<vmem>>, %arg2: memref<128x32xbf16, #tpu.memory_space<vmem>>, %arg3: memref<32x128xf32, #tpu.memory_space<vmem>>, %arg4: memref<64x128xf32, #tpu.memory_space<vmem>>) attributes {dimension_semantics = [#tpu.dimension_semantics<parallel>], iteration_bounds = array<i64: 2>, scalar_prefetch = 0 : i64, scratch_operands = 0 : i64, tpu.core_type = #tpu.core_type<tc>, window_params = [{transform_indices = @transform_0, window_bounds = array<i64: 64, 128>}, {pipeline_mode = #tpu.pipeline_mode<synchronous>, transform_indices = @transform_1, window_bounds = array<i64: 128, 32>}, {pipeline_mode = #tpu.pipeline_mode<synchronous>, transform_indices = @transform_2, window_bounds = array<i64: 32, 128>}, {transform_indices = @transform_3, window_bounds = array<i64: 64, 128>}]} {
    %c0 = arith.constant 0 : index
    %c0_0 = arith.constant 0 : index
    %0 = vector.load %arg1[%c0, %c0_0] : memref<64x128xbf16, #tpu.memory_space<vmem>>, vector<64x128xbf16>
    %c0_1 = arith.constant 0 : index
    %c0_2 = arith.constant 0 : index
    %1 = vector.load %arg2[%c0_1, %c0_2] : memref<128x32xbf16, #tpu.memory_space<vmem>>, vector<128x32xbf16>
    %cst = arith.constant dense<0.000000e+00> : vector<64x32xf32>
    %2 = tpu.matmul %0, %1, %cst {dimension_numbers = #tpu.dot_dimension_numbers<[1], [0], [0], [1], [0, 0, 1, 1], [], []>} : vector<64x128xbf16>, vector<128x32xbf16>, vector<64x32xf32> -> vector<64x32xf32>
    %c0_3 = arith.constant 0 : index
    %c0_4 = arith.constant 0 : index
    %3 = vector.load %arg3[%c0_3, %c0_4] : memref<32x128xf32, #tpu.memory_space<vmem>>, vector<32x128xf32>
    %cst_5 = arith.constant dense<0.000000e+00> : vector<64x128xf32>
    %4 = tpu.matmul %2, %3, %cst_5 {dimension_numbers = #tpu.dot_dimension_numbers<[1], [0], [0], [1], [0, 0, 1, 1], [], []>} : vector<64x32xf32>, vector<32x128xf32>, vector<64x128xf32> -> vector<64x128xf32>
    %c0_6 = arith.constant 0 : index
    %c0_7 = arith.constant 0 : index
    %5 = vector.load %arg4[%c0_6, %c0_7] : memref<64x128xf32, #tpu.memory_space<vmem>>, vector<64x128xf32>
    tpu.vector_store %arg4[%c0_6, %c0_7], %4 {strides = array<i32>} : memref<64x128xf32, #tpu.memory_space<vmem>>, vector<64x128xf32>,
    return
  }
  func.func @transform_0(%arg0: i32) -> (i32, i32) {
    %c0_i32 = arith.constant 0 : i32
    %c0_i32_0 = arith.constant 0 : i32
    return %arg0, %c0_i32 : i32, i32
  }
  func.func @transform_1(%arg0: i32) -> (i32, i32) {
    %c0_i32 = arith.constant 0 : i32
    %c0_i32_0 = arith.constant 0 : i32
    %c0_i32_1 = arith.constant 0 : i32
    return %c0_i32, %c0_i32_0 : i32, i32
  }
  func.func @transform_2(%arg0: i32) -> (i32, i32) {
    %c0_i32 = arith.constant 0 : i32
    %c0_i32_0 = arith.constant 0 : i32
    %c0_i32_1 = arith.constant 0 : i32
    return %c0_i32, %c0_i32_0 : i32, i32
  }
  func.func @transform_3(%arg0: i32) -> (i32, i32) {
    %c0_i32 = arith.constant 0 : i32
    %c0_i32_0 = arith.constant 0 : i32
    return %arg0, %c0_i32 : i32, i32
  }
}

module attributes {stable_mosaic.version = 11 : i64} {
  func.func @kernel(%arg0: i32, %arg1: memref<64x128xbf16, #tpu.memory_space<vmem>>, %arg2: memref<128x32xbf16, #tpu.memory_space<vmem>>, %arg3: memref<32x128xf32, #tpu.memory_space<vmem>>, %arg4: memref<64x128xf32, #tpu.memory_space<vmem>>) attributes {dimension_semantics = [#tpu.dimension_semantics<parallel>], iteration_bounds = array<i64: 2>, scalar_prefetch = 0 : i64, scratch_operands = 0 : i64, tpu.core_type = #tpu.core_type<tc>, window_params = [{transform_indices = @transform_0, window_bounds = array<i64: 64, 128>}, {pipeline_mode = #tpu.pipeline_mode<synchronous>, transform_indices = @transform_1, window_bounds = array<i64: 128, 32>}, {pipeline_mode = #tpu.pipeline_mode<synchronous>, transform_indices = @transform_2, window_bounds = array<i64: 32, 128>}, {transform_indices = @transform_3, window_bounds = array<i64: 64, 128>}]} {
    %c0 = arith.constant 0 : index
    %c0_0 = arith.constant 0 : index
    %0 = vector.load %arg1[%c0, %c0_0] : memref<64x128xbf16, #tpu.memory_space<vmem>>, vector<64x128xbf16>
    %c0_1 = arith.constant 0 : index
    %c0_2 = arith.constant 0 : index
    %1 = vector.load %arg2[%c0_1, %c0_2] : memref<128x32xbf16, #tpu.memory_space<vmem>>, vector<128x32xbf16>
    %cst = arith.constant dense<0.000000e+00> : vector<64x32xf32>
    %2 = tpu.matmul %0, %1, %cst {dimension_numbers = #tpu.dot_dimension_numbers<[1], [0], [0], [1], [0, 0, 1, 1], [], []>} : vector<64x128xbf16>, vector<128x32xbf16>, vector<64x32xf32> -> vector<64x32xf32>
    %c0_3 = arith.constant 0 : index
    %c0_4 = arith.constant 0 : index
    %3 = vector.load %arg3[%c0_3, %c0_4] : memref<32x128xf32, #tpu.memory_space<vmem>>, vector<32x128xf32>
    %cst_5 = arith.constant dense<0.000000e+00> : vector<64x128xf32>
    %4 = tpu.matmul %2, %3, %cst_5 {dimension_numbers = #tpu.dot_dimension_numbers<[1], [0], [0], [1], [0, 0, 1, 1], [], []>} : vector<64x32xf32>, vector<32x128xf32>, vector<64x128xf32> -> vector<64x128xf32>
    %c0_6 = arith.constant 0 : index
    %c0_7 = arith.constant 0 : index
    %5 = vector.load %arg4[%c0_6, %c0_7] : memref<64x128xf32, #tpu.memory_space<vmem>>, vector<64x128xf32>
    tpu.vector_store %arg4[%c0_6, %c0_7], %4 {strides = array<i32>} : memref<64x128xf32, #tpu.memory_space<vmem>>, vector<64x128xf32>,
    return
  }
  func.func @transform_0(%arg0: i32) -> (i32, i32) {
    %c0_i32 = arith.constant 0 : i32
    %c0_i32_0 = arith.constant 0 : i32
    return %arg0, %c0_i32 : i32, i32
  }
  func.func @transform_1(%arg0: i32) -> (i32, i32) {
    %c0_i32 = arith.constant 0 : i32
    %c0_i32_0 = arith.constant 0 : i32
    %c0_i32_1 = arith.constant 0 : i32
    return %c0_i32, %c0_i32_0 : i32, i32
  }
  func.func @transform_2(%arg0: i32) -> (i32, i32) {
    %c0_i32 = arith.constant 0 : i32
    %c0_i32_0 = arith.constant 0 : i32
    %c0_i32_1 = arith.constant 0 : i32
    return %c0_i32, %c0_i32_0 : i32, i32
  }
  func.func @transform_3(%arg0: i32) -> (i32, i32) {
    %c0_i32 = arith.constant 0 : i32
    %c0_i32_0 = arith.constant 0 : i32
    return %arg0, %c0_i32 : i32, i32
  }
}

</mosaic_0001>

<bundles_post_ra>
// kernel: tpu_custom_call.1
= control target key start
LH: loop header
LB: loop body
LE: loop exit
PB: predicated region body
PF: predicated region fallthrough
CT: control target
= control target key end

     0   :  { %8 = vsyncpa [#allocation3], 0  ;;  %s1047_s0 = inlined_call_operand.vmem [shape: bf16[128,128], index: 0, kind: input, shape index: {}]   ;;  %s1048_s1 = inlined_call_operand.vmem [shape: bf16[128,32], index: 1, kind: input, shape index: {}]   ;;  %s1049_s2 = inlined_call_operand.hbm [shape: f32[32,128], index: 2, kind: input, shape index: {}]   ;;  %s1050_s3 = inlined_call_operand.hbm [shape: f32[128,128], index: 3, kind: output, shape index: {}]  }
   0x1   :  { %9 = vsyncpa [#allocation4], 0 }
   0x2   :  { %11 = vsyncpa [#allocation4 + $0x1], 0  ;;  %s878_s12 = smov 0   ;;  %s880_s13 = smov 0  }
   0x3   :  { %s882_s14 = smov 0   ;;  %s884_s15 = smov 0  }
   0x4 LB: > { %s899_s16 = sadd.s32 4294967295, %s850_s15   ;;  %s579_s17 = sadd.s32 4294967294, %s850_s15   ;;  %s850_s15 = sphi %s884_s15, %s1066_s15   ;;  %s846_s14 = sphi %s882_s14, %s1065_s14   ;;  %s842_s13 = sphi %s880_s13, %s1064_s13   ;;  %s838_s12 = sphi %s878_s12, %s1063_s12  }
   0x5   : > { %s903_s18 = sadd.s32 1, %s850_s15   ;;  %s92_s19 = sadd.s32 1, %s846_s14 }
   0x6   : > { %s89_s20 = ssub.s32 %s850_s15, %s903_s18  ;;  %p102_p0 = scmp.ne.s32.totalorder %s846_s14, %s842_s13 }
   0x7   : > { %p90_p1 = scmp.eq.s32.totalorder %s89_s20, 0  ;;  %p103_p2 = scmp.eq.s32.totalorder %s899_s16, 1 }
   0x8   : > { %p108_p3 = scmp.ne.s32.totalorder %s842_s13, %s838_s12  ;;  %p109_p4 = scmp.eq.s32.totalorder %s579_s17, 1 }
   0x9   : > { %s914_s21 = scalar_select %p90_p1, %s846_s14, %s92_s19  }
   0xa   : > { %p916_p5 = por %p103_p2, %p102_p0  ;;  %p920_p6 = por %p109_p4, %p108_p3 }
   0xb   : > { %p580_p7 = scmp.ge.s32.totalorder %s850_s15, 1  ;;  %p116_p8 = scmp.lt.s32.totalorder %s850_s15, 3 }
   0xc   : > { %s1054_s22 = scalar_select %p916_p5, 1, 0 }
   0xd   : > { %s1055_s23 = scalar_select %p920_p6, 1, 0 }
   0xe   : > { %p1051_p9 = scmp.eq.s32.totalorder %s899_s16, 0  ;;  %p927_p10 = pnand %p580_p7, %p116_p8 }
   0xf   : > { %s852_s25 = smov [#allocation2]   ;;  %s756_s30 = scalar_lea.hbm %s1049_s2, 512 }
  0x10   : > { %s1056_s24 = scalar_select %p927_p10, 1, 0 }
  0x11   : > { %s131_s26 = sshll.u32 %s852_s25, 4  ;;  %p696_p11 = pneg %p927_p10  ;;  %s132_s26 = int_to_ptr.vmem [resolvable:$true] %s131_s26 }
  0x12   : > { %p757_p13 = scmp.ne.s32.totalorder %s1049_s2, %s756_s30  ;;  %p763_p3 = scmp.lt.u32.totalorder %s756_s30, %s1049_s2 }
  0x13   : > { %p935_p12 = pnand %p1051_p9, %p696_p11 }
  0x15   : > { %p758_p0 = pneg %p935_p12 }
  0x17   : > { %p759_p1 = pnand %p758_p0, %p757_p13 }
  0x19   : > { %p760_p2 = pneg %p759_p1 }
  0x1b   : > { %p765_p4 = pnand %p763_p3, %p760_p2 }
  0x1d   : > { %768 = shalt.err (!%p765_p4)
}
  0x1e   : > { %s769_s8 = scalar_lea.vmem %s132_s26, 512  ;;  %p777_p9 = scmp.lt.s32.totalorder %s132_s26, %s132_s26 }
  0x1f   : > { %p770_p7 = scmp.ne.s32.totalorder %s132_s26, %s769_s8  ;;  %p778_p6 = scmp.lt.s32.totalorder %s769_s8, %s769_s8 }
  0x21   : > { %p772_p8 = pnand %p770_p7, %p758_p0  ;;  %p779_p5 = por %p778_p6, %p777_p9 }
  0x23   : > { %p773_p11 = pneg %p772_p8 }
  0x25   : > { %p780_p10 = pnand %p779_p5, %p773_p11 }
  0x27   : > { %783 = shalt.err (!%p780_p10)
}
  0x28   : > { %s853_s9 = smov 128   ;;  %s854_s10 = smov 8  }
  0x29   : > { %699 = dma.hbm_to_vmem [thread:$0]  (!%p935_p12), %s1049_s2, 512, %s132_s26, [#allocation3], %s853_s9, %s853_s9, %s854_s10  }
  0x2a   : > { %p1058_p13 = scmp.ne.s32.totalorder %s1056_s24, 0 }
  0x2b   : > { %p1059_p1 = scmp.eq.s32.totalorder (!%p1058_p13), %s899_s16, 0 }
  0x2c   : > { %156 = sbr.rel (%p1058_p13) target bundleno = 540 (0x21c), region = 32 }
  0x33   : > { %829 = dma.done.wait (%p1059_p1), [#allocation3], 512   ;;  %p1060_p0 = pmov %p1059_p1 }
  0x34   : > { %s586_s19 = sshll.u32 %s899_s16, 3  ;;  %v744_v0 = vld [vmem:[%s1048_s1] sm:$0xff]   ;;  %v745_v1 = vld [vmem:[%s1048_s1 + $0x8] sm:$0xff]   ;;  %v746_v2 = vld [vmem:[%s1048_s1 + $0x10] sm:$0xff]   ;;  %vm353_vm0 = vcmask 261120   ;;  %s177_s27 = sand.u32 1, %s842_s13  }
  0x35   : > { %831 = vsyncadd (%p1060_p0), [#allocation3], 4294966784  ;;  %p181_p5 = scmp.lt.s32.totalorder %s586_s19, 15  ;;  %638 = vmatprep.subr.bf16.mxu0 %v744_v0  ;;  %v747_v3 = vld [vmem:[%s1048_s1 + $0x18] sm:$0xff]   ;;  %v748_v5 = vld [vmem:[%s1048_s1 + $0x20] sm:$0xff]   ;;  %s585_s28 = sshll.u32 %s177_s27, 6 }
  0x36   : > { %639 = vmatpush3.bf16.msra.mxu0 %v744_v0  ;;  %v349_v6 = vld [vmem:[#allocation2] sm:$0xff]  ;;  %v350_v7 = vld [vmem:[#allocation2 + $0x8] sm:$0xff]  ;;  %v750_v10 = vld [vmem:[%s1048_s1 + $0x30] sm:$0xff]   ;;  %s613_s29 = sshll.u32 %s899_s16, 10  ;;  %s1006_s6 = scalar_lea.sflag [#allocation4], %s177_s27 }
  0x37   : > { %s1068_s19 = smov (!%p181_p5, %s586_s19), 15  ;;  %640 = vmatprep.subr.bf16.mxu0 %v745_v1  ;;  %v682_v8 = vpack.c.bf16 %v350_v7, %v349_v6  ;;  %v749_v9 = vld [vmem:[%s1048_s1 + $0x28] sm:$0xff]   ;;  %v751_v11 = vld [vmem:[%s1048_s1 + $0x38] sm:$0xff]   ;;  %v351_v15 = vld [vmem:[#allocation2 + $0x10] sm:$0xff]  ;;  %p1061_p9 = scmp.ne.s32.totalorder %s1054_s22, 0 }
  0x38   : > { %s587_s24 = sshll.u32 %s1068_s19, 2  ;;  %v352_v16 = vld [vmem:[#allocation2 + $0x18] sm:$0xff]  ;;  %s855_s7 = smov [#allocation5]  }
  0x39   : > { %s184_s5 = scalar_lea.vmem %s1047_s0, %s587_s24  ;;  %683 = vmatprep.subr.bf16.mxu1 %v682_v8  ;;  %v686_v17 = vpack.c.bf16 %v352_v16, %v351_v15  ;;  %s179_s24 = scalar_lea.vmem [#allocation5], %s585_s28 }
  0x3a   : > { %641 = vmatpush3.bf16.msra.mxu0 %v745_v1  ;;  %v752_v4 = vld [vmem:[%s184_s5] sm:$0xff]   ;;  %685 = vmatpush3.bf16.msra.mxu1 %v682_v8  ;;  %v753_v12 = vld [vmem:[%s184_s5 + $0x8] sm:$0xff]   ;;  %v754_v13 = vld [vmem:[%s184_s5 + $0x10] sm:$0xff]   ;;  %s505_s26 = sshll.u32 %s179_s24, 4  ;;  %s788_s8 = sshll.u32 %s855_s7, 4  ;;  %s999_s26 = int_to_ptr.vmem [resolvable:$true] %s505_s26  ;;  %s789_s8 = int_to_ptr.vmem [resolvable:$false] %s788_s8 }
  0x3b   : > { %642 = vmatprep.subr.bf16.mxu0 %v746_v2  ;;  %654 = vmatprep.mubr.bf16.mxu0 %v752_v4  ;;  %v755_v14 = vld [vmem:[%s184_s5 + $0x18] sm:$0xff]   ;;  %s1004_s5 = scalar_lea.hbm %s1050_s3, %s613_s29  ;;  %s784_s16 = scalar_lea.vmem %s999_s26, 1024 }
  0x3c   : > { %687 = vmatprep.subr.bf16.mxu1 %v686_v17  ;;  %p785_p6 = scmp.ne.s32.totalorder %s999_s26, %s784_s16  ;;  %s790_s9 = scalar_lea.vmem %s789_s8, 2048 }
  0x3d   : > { %p791_p2 = scmp.lt.s32.totalorder %s999_s26, %s789_s8  ;;  %p792_p3 = scmp.lt.s32.totalorder %s790_s9, %s784_s16 }
  0x3e   : > { %643 = vmatpush3.bf16.msra.mxu0 %v746_v2  ;;  %689 = vmatpush3.bf16.msra.mxu1 %v686_v17  ;;  %p786_p10 = pnand %p785_p6, %p1061_p9 }
  0x3f   : > { %644 = vmatprep.subr.bf16.mxu0 %v747_v3  ;;  %p793_p4 = por %p792_p3, %p791_p2 }
  0x40   : > { %p787_p12 = pneg %p786_p10 }
  0x42   : > { %645 = vmatpush3.bf16.msra.mxu0 %v747_v3  ;;  %p794_p7 = pnand %p793_p4, %p787_p12 }
  0x43   : > { %646 = vmatprep.subr.bf16.mxu0 %v748_v5 }
  0x46   : > { %647 = vmatpush3.bf16.msra.mxu0 %v748_v5 }
  0x47   : > { %648 = vmatprep.subr.bf16.mxu0 %v749_v9 }
  0x4a   : > { %649 = vmatpush3.bf16.msra.mxu0 %v749_v9 }
  0x4b   : > { %650 = vmatprep.subr.bf16.mxu0 %v750_v10 }
  0x4e   : > { %651 = vmatpush3.bf16.msra.mxu0 %v750_v10 }
  0x4f   : > { %652 = vmatprep.subr.bf16.mxu0 %v751_v11 }
  0x52   : > { %653 = vmatpush3.bf16.msra.mxu0 %v751_v11 }
  0x55   : > { %655 = vmatmul.mubr.bf16.vlgmr.msra.gmra.mrb[0].mxu0 %v753_v12 }
  0x56   : > { %658 = vmatprep.mubr.bf16.mxu0 %v754_v13 }
  0x5d   : > { %659 = vmatmul.mubr.bf16.gmra.mrb[4].mxu0 %v755_v14 }
 0x128   : > { %v656_v18 = vpop.f32.mrb[0].mxu0 }
 0x129   : > { %v318_v19 = vpop.f32.mrb[1].mxu0 }
 0x12a   : > { %v657_v20 = vpop.f32.mrb[2].mxu0  ;;  %670 = vmatprep.mubr.msk.f32.mxu1 %vm353_vm0, %v318_v19 }
 0x12b   : > { %v321_v21 = vpop.f32.mrb[3].mxu0 }
 0x12c   : > { %671 = vmatmul.mubr.msk.f32.vlgmr.msra.gmra.mrb[0].mxu1 %vm353_vm0, %v321_v21 }
 0x12d   : > { %673 = vmatprep.mubr.msk.f32.mxu1 %vm353_vm0, %v656_v18 }
 0x130   : > { %v660_v22 = vpop.f32.mrb[4].mxu0  ;;  %674 = vmatmul.mubr.msk.f32.gmra.mrb[2].mxu1 %vm353_vm0, %v657_v20 }
 0x131   : > { %v334_v23 = vpop.f32.mrb[5].mxu0 }
 0x132   : > { %v661_v24 = vpop.f32.mrb[6].mxu0  ;;  %676 = vmatprep.mubr.msk.f32.mxu1 %vm353_vm0, %v334_v23 }
 0x133   : > { %v337_v25 = vpop.f32.mrb[7].mxu0 }
 0x134   : > { %677 = vmatmul.mubr.msk.f32.gmra.mrb[4].mxu1 %vm353_vm0, %v337_v25 }
 0x135   : > { %679 = vmatprep.mubr.msk.f32.mxu1 %vm353_vm0, %v660_v22 }
 0x138   : > { %680 = vmatmul.mubr.msk.f32.gmra.mrb[6].mxu1 %vm353_vm0, %v661_v24 }
 0x1ff   : > { %v672_v26 = vpop.f32.mrb[0].mxu1 }
 0x200   : > { %484 = vst [vmem:[%s179_s24 + $0x8] sm:$0xff] %v672_v26  ;;  %v444_v27 = vpop.f32.mrb[1].mxu1 }
 0x201   : > { %483 = vst [vmem:[%s179_s24] sm:$0xff] %v444_v27 }
 0x203   : > { %v675_v28 = vpop.f32.mrb[2].mxu1 }
 0x204   : > { %486 = vst [vmem:[%s179_s24 + $0x18] sm:$0xff] %v675_v28  ;;  %v454_v29 = vpop.f32.mrb[3].mxu1 }
 0x205   : > { %485 = vst [vmem:[%s179_s24 + $0x10] sm:$0xff] %v454_v29 }
 0x207   : > { %v678_v30 = vpop.f32.mrb[4].mxu1 }
 0x208   : > { %488 = vst [vmem:[%s179_s24 + $0x28] sm:$0xff] %v678_v30  ;;  %v464_v31 = vpop.f32.mrb[5].mxu1 }
 0x209   : > { %487 = vst [vmem:[%s179_s24 + $0x20] sm:$0xff] %v464_v31 }
 0x20b   : > { %v681_v32 = vpop.f32.mrb[6].mxu1 }
 0x20c   : > { %490 = vst [vmem:[%s179_s24 + $0x38] sm:$0xff] %v681_v32  ;;  %v474_v33 = vpop.f32.mrb[7].mxu1 }
 0x20d   : > { %489 = vst [vmem:[%s179_s24 + $0x30] sm:$0xff] %v474_v33 }
 0x20e   : > { %797 = shalt.err (!%p794_p7)
}
 0x20f   : > { %s798_s10 = scalar_lea.hbm %s1004_s5, 1024  ;;  %s802_s19 = scalar_lea.hbm %s1050_s3, 2048 }
 0x210   : > { %p799_p8 = scmp.ne.s32.totalorder %s1004_s5, %s798_s10  ;;  %p803_p1 = scmp.lt.u32.totalorder %s1004_s5, %s1050_s3 }
 0x211   : > { %p804_p0 = scmp.lt.u32.totalorder %s802_s19, %s798_s10  ;;  %p806_p6 = scmp.lt.u32.totalorder %s798_s10, %s1004_s5 }
 0x212   : > { %p800_p11 = pnand %p799_p8, %p1061_p9 }
 0x213   : > { %p805_p5 = por %p804_p0, %p803_p1 }
 0x214   : > { %p801_p13 = pneg %p800_p11 }
 0x215   : > { %p807_p10 = por %p806_p6, %p805_p5 }
 0x217   : > { %p808_p12 = pnand %p807_p10, %p801_p13 }
 0x219   : > { %811 = shalt.err (!%p808_p12)
}
 0x21a   : > { %s856_s27 = smov 128   ;;  %s857_s28 = smov 8  }
 0x21b   : > { %694 = dma.vmem_to_hbm [thread:$0]  (%p1061_p9), %s999_s26, 1024, %s1004_s5, %s1006_s6, %s856_s27, %s856_s27, %s857_s28  }
 0x21c PF: > { %p706_p2 = scmp.ge.s32.totalorder %s850_s15, 2  ;;  %s520_s24 = sand.u32 1, %s838_s12  }
 0x21d   : > { %p1062_p3 = scmp.ne.s32.totalorder %s1055_s23, 0  ;;  %s521_s29 = scalar_lea.sflag [#allocation4], %s520_s24 }
 0x21f   : > { %p701_p4 = pnand %p706_p2, %p1062_p3 }
 0x221   : > { %833 = dma.done.wait (!%p701_p4), %s521_s29, 1024  }
 0x222   : > { %835 = vsyncadd (!%p701_p4), %s521_s29, 4294966272  ;;  %p14_p7 = scmp.ge.s32.totalorder %s903_s18, 4   ;;  %s1063_s12 = smov %s842_s13 }
 0x223   : > { %s1064_s13 = smov %s846_s14  ;;  %s1065_s14 = smov %s914_s21 }
 0x224   : > { %s1066_s15 = smov %s903_s18  ;;  %16 = sbr.rel (!%p14_p7) target bundleno = 4 (0x4), region = 72 }
 0x22b   :  { %526 = vsyncpa [#allocation3], 1 }
 0x22c   :  { %528 = vsyncpa [#allocation3 + $0x1], 1 }
 0x22d   :  { %529 = vsyncpa [#allocation4], 1 }
 0x22e   :  { %531 = vsyncpa [#allocation4 + $0x1], 1 }

// kernel: tpu_custom_call.1
= control target key start
LH: loop header
LB: loop body
LE: loop exit
PB: predicated region body
PF: predicated region fallthrough
CT: control target
= control target key end

     0   :  { %8 = vsyncpa [#allocation3], 0  ;;  %s1047_s0 = inlined_call_operand.vmem [shape: bf16[128,128], index: 0, kind: input, shape index: {}]   ;;  %s1048_s1 = inlined_call_operand.vmem [shape: bf16[128,32], index: 1, kind: input, shape index: {}]   ;;  %s1049_s2 = inlined_call_operand.hbm [shape: f32[32,128], index: 2, kind: input, shape index: {}]   ;;  %s1050_s3 = inlined_call_operand.hbm [shape: f32[128,128], index: 3, kind: output, shape index: {}]  }
   0x1   :  { %9 = vsyncpa [#allocation4], 0 }
   0x2   :  { %11 = vsyncpa [#allocation4 + $0x1], 0  ;;  %s878_s12 = smov 0   ;;  %s880_s13 = smov 0  }
   0x3   :  { %s882_s14 = smov 0   ;;  %s884_s15 = smov 0  }
   0x4 LB: > { %s899_s16 = sadd.s32 4294967295, %s850_s15   ;;  %s579_s17 = sadd.s32 4294967294, %s850_s15   ;;  %s850_s15 = sphi %s884_s15, %s1066_s15   ;;  %s846_s14 = sphi %s882_s14, %s1065_s14   ;;  %s842_s13 = sphi %s880_s13, %s1064_s13   ;;  %s838_s12 = sphi %s878_s12, %s1063_s12  }
   0x5   : > { %s903_s18 = sadd.s32 1, %s850_s15   ;;  %s92_s19 = sadd.s32 1, %s846_s14 }
   0x6   : > { %s89_s20 = ssub.s32 %s850_s15, %s903_s18  ;;  %p102_p0 = scmp.ne.s32.totalorder %s846_s14, %s842_s13 }
   0x7   : > { %p90_p1 = scmp.eq.s32.totalorder %s89_s20, 0  ;;  %p103_p2 = scmp.eq.s32.totalorder %s899_s16, 1 }
   0x8   : > { %p108_p3 = scmp.ne.s32.totalorder %s842_s13, %s838_s12  ;;  %p109_p4 = scmp.eq.s32.totalorder %s579_s17, 1 }
   0x9   : > { %s914_s21 = scalar_select %p90_p1, %s846_s14, %s92_s19  }
   0xa   : > { %p916_p5 = por %p103_p2, %p102_p0  ;;  %p920_p6 = por %p109_p4, %p108_p3 }
   0xb   : > { %p580_p7 = scmp.ge.s32.totalorder %s850_s15, 1  ;;  %p116_p8 = scmp.lt.s32.totalorder %s850_s15, 3 }
   0xc   : > { %s1054_s22 = scalar_select %p916_p5, 1, 0 }
   0xd   : > { %s1055_s23 = scalar_select %p920_p6, 1, 0 }
   0xe   : > { %p1051_p9 = scmp.eq.s32.totalorder %s899_s16, 0  ;;  %p927_p10 = pnand %p580_p7, %p116_p8 }
   0xf   : > { %s852_s25 = smov [#allocation2]   ;;  %s756_s30 = scalar_lea.hbm %s1049_s2, 512 }
  0x10   : > { %s1056_s24 = scalar_select %p927_p10, 1, 0 }
  0x11   : > { %s131_s26 = sshll.u32 %s852_s25, 4  ;;  %p696_p11 = pneg %p927_p10  ;;  %s132_s26 = int_to_ptr.vmem [resolvable:$true] %s131_s26 }
  0x12   : > { %p757_p13 = scmp.ne.s32.totalorder %s1049_s2, %s756_s30  ;;  %p763_p3 = scmp.lt.u32.totalorder %s756_s30, %s1049_s2 }
  0x13   : > { %p935_p12 = pnand %p1051_p9, %p696_p11 }
  0x15   : > { %p758_p0 = pneg %p935_p12 }
  0x17   : > { %p759_p1 = pnand %p758_p0, %p757_p13 }
  0x19   : > { %p760_p2 = pneg %p759_p1 }
  0x1b   : > { %p765_p4 = pnand %p763_p3, %p760_p2 }
  0x1d   : > { %768 = shalt.err (!%p765_p4)
}
  0x1e   : > { %s769_s8 = scalar_lea.vmem %s132_s26, 512  ;;  %p777_p9 = scmp.lt.s32.totalorder %s132_s26, %s132_s26 }
  0x1f   : > { %p770_p7 = scmp.ne.s32.totalorder %s132_s26, %s769_s8  ;;  %p778_p6 = scmp.lt.s32.totalorder %s769_s8, %s769_s8 }
  0x21   : > { %p772_p8 = pnand %p770_p7, %p758_p0  ;;  %p779_p5 = por %p778_p6, %p777_p9 }
  0x23   : > { %p773_p11 = pneg %p772_p8 }
  0x25   : > { %p780_p10 = pnand %p779_p5, %p773_p11 }
  0x27   : > { %783 = shalt.err (!%p780_p10)
}
  0x28   : > { %s853_s9 = smov 128   ;;  %s854_s10 = smov 8  }
  0x29   : > { %699 = dma.hbm_to_vmem [thread:$0]  (!%p935_p12), %s1049_s2, 512, %s132_s26, [#allocation3], %s853_s9, %s853_s9, %s854_s10  }
  0x2a   : > { %p1058_p13 = scmp.ne.s32.totalorder %s1056_s24, 0 }
  0x2b   : > { %p1059_p1 = scmp.eq.s32.totalorder (!%p1058_p13), %s899_s16, 0 }
  0x2c   : > { %156 = sbr.rel (%p1058_p13) target bundleno = 540 (0x21c), region = 32 }
  0x33   : > { %829 = dma.done.wait (%p1059_p1), [#allocation3], 512   ;;  %p1060_p0 = pmov %p1059_p1 }
  0x34   : > { %s586_s19 = sshll.u32 %s899_s16, 3  ;;  %v744_v0 = vld [vmem:[%s1048_s1] sm:$0xff]   ;;  %v745_v1 = vld [vmem:[%s1048_s1 + $0x8] sm:$0xff]   ;;  %v746_v2 = vld [vmem:[%s1048_s1 + $0x10] sm:$0xff]   ;;  %vm353_vm0 = vcmask 261120   ;;  %s177_s27 = sand.u32 1, %s842_s13  }
  0x35   : > { %831 = vsyncadd (%p1060_p0), [#allocation3], 4294966784  ;;  %p181_p5 = scmp.lt.s32.totalorder %s586_s19, 15  ;;  %638 = vmatprep.subr.bf16.mxu0 %v744_v0  ;;  %v747_v3 = vld [vmem:[%s1048_s1 + $0x18] sm:$0xff]   ;;  %v748_v5 = vld [vmem:[%s1048_s1 + $0x20] sm:$0xff]   ;;  %s585_s28 = sshll.u32 %s177_s27, 6 }
  0x36   : > { %639 = vmatpush3.bf16.msra.mxu0 %v744_v0  ;;  %v349_v6 = vld [vmem:[#allocation2] sm:$0xff]  ;;  %v350_v7 = vld [vmem:[#allocation2 + $0x8] sm:$0xff]  ;;  %v750_v10 = vld [vmem:[%s1048_s1 + $0x30] sm:$0xff]   ;;  %s613_s29 = sshll.u32 %s899_s16, 10  ;;  %s1006_s6 = scalar_lea.sflag [#allocation4], %s177_s27 }
  0x37   : > { %s1068_s19 = smov (!%p181_p5, %s586_s19), 15  ;;  %640 = vmatprep.subr.bf16.mxu0 %v745_v1  ;;  %v682_v8 = vpack.c.bf16 %v350_v7, %v349_v6  ;;  %v749_v9 = vld [vmem:[%s1048_s1 + $0x28] sm:$0xff]   ;;  %v751_v11 = vld [vmem:[%s1048_s1 + $0x38] sm:$0xff]   ;;  %v351_v15 = vld [vmem:[#allocation2 + $0x10] sm:$0xff]  ;;  %p1061_p9 = scmp.ne.s32.totalorder %s1054_s22, 0 }
  0x38   : > { %s587_s24 = sshll.u32 %s1068_s19, 2  ;;  %v352_v16 = vld [vmem:[#allocation2 + $0x18] sm:$0xff]  ;;  %s855_s7 = smov [#allocation5]  }
  0x39   : > { %s184_s5 = scalar_lea.vmem %s1047_s0, %s587_s24  ;;  %683 = vmatprep.subr.bf16.mxu1 %v682_v8  ;;  %v686_v17 = vpack.c.bf16 %v352_v16, %v351_v15  ;;  %s179_s24 = scalar_lea.vmem [#allocation5], %s585_s28 }
  0x3a   : > { %641 = vmatpush3.bf16.msra.mxu0 %v745_v1  ;;  %v752_v4 = vld [vmem:[%s184_s5] sm:$0xff]   ;;  %685 = vmatpush3.bf16.msra.mxu1 %v682_v8  ;;  %v753_v12 = vld [vmem:[%s184_s5 + $0x8] sm:$0xff]   ;;  %v754_v13 = vld [vmem:[%s184_s5 + $0x10] sm:$0xff]   ;;  %s505_s26 = sshll.u32 %s179_s24, 4  ;;  %s788_s8 = sshll.u32 %s855_s7, 4  ;;  %s999_s26 = int_to_ptr.vmem [resolvable:$true] %s505_s26  ;;  %s789_s8 = int_to_ptr.vmem [resolvable:$false] %s788_s8 }
  0x3b   : > { %642 = vmatprep.subr.bf16.mxu0 %v746_v2  ;;  %654 = vmatprep.mubr.bf16.mxu0 %v752_v4  ;;  %v755_v14 = vld [vmem:[%s184_s5 + $0x18] sm:$0xff]   ;;  %s1004_s5 = scalar_lea.hbm %s1050_s3, %s613_s29  ;;  %s784_s16 = scalar_lea.vmem %s999_s26, 1024 }
  0x3c   : > { %687 = vmatprep.subr.bf16.mxu1 %v686_v17  ;;  %p785_p6 = scmp.ne.s32.totalorder %s999_s26, %s784_s16  ;;  %s790_s9 = scalar_lea.vmem %s789_s8, 2048 }
  0x3d   : > { %p791_p2 = scmp.lt.s32.totalorder %s999_s26, %s789_s8  ;;  %p792_p3 = scmp.lt.s32.totalorder %s790_s9, %s784_s16 }
  0x3e   : > { %643 = vmatpush3.bf16.msra.mxu0 %v746_v2  ;;  %689 = vmatpush3.bf16.msra.mxu1 %v686_v17  ;;  %p786_p10 = pnand %p785_p6, %p1061_p9 }
  0x3f   : > { %644 = vmatprep.subr.bf16.mxu0 %v747_v3  ;;  %p793_p4 = por %p792_p3, %p791_p2 }
  0x40   : > { %p787_p12 = pneg %p786_p10 }
  0x42   : > { %645 = vmatpush3.bf16.msra.mxu0 %v747_v3  ;;  %p794_p7 = pnand %p793_p4, %p787_p12 }
  0x43   : > { %646 = vmatprep.subr.bf16.mxu0 %v748_v5 }
  0x46   : > { %647 = vmatpush3.bf16.msra.mxu0 %v748_v5 }
  0x47   : > { %648 = vmatprep.subr.bf16.mxu0 %v749_v9 }
  0x4a   : > { %649 = vmatpush3.bf16.msra.mxu0 %v749_v9 }
  0x4b   : > { %650 = vmatprep.subr.bf16.mxu0 %v750_v10 }
  0x4e   : > { %651 = vmatpush3.bf16.msra.mxu0 %v750_v10 }
  0x4f   : > { %652 = vmatprep.subr.bf16.mxu0 %v751_v11 }
  0x52   : > { %653 = vmatpush3.bf16.msra.mxu0 %v751_v11 }
  0x55   : > { %655 = vmatmul.mubr.bf16.vlgmr.msra.gmra.mrb[0].mxu0 %v753_v12 }
  0x56   : > { %658 = vmatprep.mubr.bf16.mxu0 %v754_v13 }
  0x5d   : > { %659 = vmatmul.mubr.bf16.gmra.mrb[4].mxu0 %v755_v14 }
 0x128   : > { %v656_v18 = vpop.f32.mrb[0].mxu0 }
 0x129   : > { %v318_v19 = vpop.f32.mrb[1].mxu0 }
 0x12a   : > { %v657_v20 = vpop.f32.mrb[2].mxu0  ;;  %670 = vmatprep.mubr.msk.f32.mxu1 %vm353_vm0, %v318_v19 }
 0x12b   : > { %v321_v21 = vpop.f32.mrb[3].mxu0 }
 0x12c   : > { %671 = vmatmul.mubr.msk.f32.vlgmr.msra.gmra.mrb[0].mxu1 %vm353_vm0, %v321_v21 }
 0x12d   : > { %673 = vmatprep.mubr.msk.f32.mxu1 %vm353_vm0, %v656_v18 }
 0x130   : > { %v660_v22 = vpop.f32.mrb[4].mxu0  ;;  %674 = vmatmul.mubr.msk.f32.gmra.mrb[2].mxu1 %vm353_vm0, %v657_v20 }
 0x131   : > { %v334_v23 = vpop.f32.mrb[5].mxu0 }
 0x132   : > { %v661_v24 = vpop.f32.mrb[6].mxu0  ;;  %676 = vmatprep.mubr.msk.f32.mxu1 %vm353_vm0, %v334_v23 }
 0x133   : > { %v337_v25 = vpop.f32.mrb[7].mxu0 }
 0x134   : > { %677 = vmatmul.mubr.msk.f32.gmra.mrb[4].mxu1 %vm353_vm0, %v337_v25 }
 0x135   : > { %679 = vmatprep.mubr.msk.f32.mxu1 %vm353_vm0, %v660_v22 }
 0x138   : > { %680 = vmatmul.mubr.msk.f32.gmra.mrb[6].mxu1 %vm353_vm0, %v661_v24 }
 0x1ff   : > { %v672_v26 = vpop.f32.mrb[0].mxu1 }
 0x200   : > { %484 = vst [vmem:[%s179_s24 + $0x8] sm:$0xff] %v672_v26  ;;  %v444_v27 = vpop.f32.mrb[1].mxu1 }
 0x201   : > { %483 = vst [vmem:[%s179_s24] sm:$0xff] %v444_v27 }
 0x203   : > { %v675_v28 = vpop.f32.mrb[2].mxu1 }
 0x204   : > { %486 = vst [vmem:[%s179_s24 + $0x18] sm:$0xff] %v675_v28  ;;  %v454_v29 = vpop.f32.mrb[3].mxu1 }
 0x205   : > { %485 = vst [vmem:[%s179_s24 + $0x10] sm:$0xff] %v454_v29 }
 0x207   : > { %v678_v30 = vpop.f32.mrb[4].mxu1 }
 0x208   : > { %488 = vst [vmem:[%s179_s24 + $0x28] sm:$0xff] %v678_v30  ;;  %v464_v31 = vpop.f32.mrb[5].mxu1 }
 0x209   : > { %487 = vst [vmem:[%s179_s24 + $0x20] sm:$0xff] %v464_v31 }
 0x20b   : > { %v681_v32 = vpop.f32.mrb[6].mxu1 }
 0x20c   : > { %490 = vst [vmem:[%s179_s24 + $0x38] sm:$0xff] %v681_v32  ;;  %v474_v33 = vpop.f32.mrb[7].mxu1 }
 0x20d   : > { %489 = vst [vmem:[%s179_s24 + $0x30] sm:$0xff] %v474_v33 }
 0x20e   : > { %797 = shalt.err (!%p794_p7)
}
 0x20f   : > { %s798_s10 = scalar_lea.hbm %s1004_s5, 1024  ;;  %s802_s19 = scalar_lea.hbm %s1050_s3, 2048 }
 0x210   : > { %p799_p8 = scmp.ne.s32.totalorder %s1004_s5, %s798_s10  ;;  %p803_p1 = scmp.lt.u32.totalorder %s1004_s5, %s1050_s3 }
 0x211   : > { %p804_p0 = scmp.lt.u32.totalorder %s802_s19, %s798_s10  ;;  %p806_p6 = scmp.lt.u32.totalorder %s798_s10, %s1004_s5 }
 0x212   : > { %p800_p11 = pnand %p799_p8, %p1061_p9 }
 0x213   : > { %p805_p5 = por %p804_p0, %p803_p1 }
 0x214   : > { %p801_p13 = pneg %p800_p11 }
 0x215   : > { %p807_p10 = por %p806_p6, %p805_p5 }
 0x217   : > { %p808_p12 = pnand %p807_p10, %p801_p13 }
 0x219   : > { %811 = shalt.err (!%p808_p12)
}
 0x21a   : > { %s856_s27 = smov 128   ;;  %s857_s28 = smov 8  }
 0x21b   : > { %694 = dma.vmem_to_hbm [thread:$0]  (%p1061_p9), %s999_s26, 1024, %s1004_s5, %s1006_s6, %s856_s27, %s856_s27, %s857_s28  }
 0x21c PF: > { %p706_p2 = scmp.ge.s32.totalorder %s850_s15, 2  ;;  %s520_s24 = sand.u32 1, %s838_s12  }
 0x21d   : > { %p1062_p3 = scmp.ne.s32.totalorder %s1055_s23, 0  ;;  %s521_s29 = scalar_lea.sflag [#allocation4], %s520_s24 }
 0x21f   : > { %p701_p4 = pnand %p706_p2, %p1062_p3 }
 0x221   : > { %833 = dma.done.wait (!%p701_p4), %s521_s29, 1024  }
 0x222   : > { %835 = vsyncadd (!%p701_p4), %s521_s29, 4294966272  ;;  %p14_p7 = scmp.ge.s32.totalorder %s903_s18, 4   ;;  %s1063_s12 = smov %s842_s13 }
 0x223   : > { %s1064_s13 = smov %s846_s14  ;;  %s1065_s14 = smov %s914_s21 }
 0x224   : > { %s1066_s15 = smov %s903_s18  ;;  %16 = sbr.rel (!%p14_p7) target bundleno = 4 (0x4), region = 72 }
 0x22b   :  { %526 = vsyncpa [#allocation3], 1 }
 0x22c   :  { %528 = vsyncpa [#allocation3 + $0x1], 1 }
 0x22d   :  { %529 = vsyncpa [#allocation4], 1 }
 0x22e   :  { %531 = vsyncpa [#allocation4 + $0x1], 1 }

</bundles_post_ra>
